<compile_context>
chip_gen: v7x
topology: tpu7x:2x2x1
jax: 0.10.0
libtpu: 0.0.40
codegen_flags: <defaults>
</compile_context>

<pallas_src>
import jax
import jax.numpy as jnp
from jax import lax
from jax.experimental import pallas as pl
from jax.experimental.pallas import tpu as pltpu


def _round_up(x, m):
    return ((x + m - 1) // m) * m


def _bbb_linear_kernel(x_ref, w_mu_ref, w_rho_ref, w_eps_ref,
                       b_mu_ref, b_rho_ref, b_eps_ref, out_ref, acc_ref):
    k = pl.program_id(2)

    @pl.when(k == 0)
    def _():
        acc_ref[...] = jnp.zeros_like(acc_ref)

    # Weight reparameterization on the current (tn, tk) tile (VPU + EUP).
    # log1p(exp(x)) kept literally to match the PyTorch source.
    w_sigma = jnp.log1p(jnp.exp(w_rho_ref[...]))            # (tn, tk)
    weight = w_mu_ref[...] + w_eps_ref[...] * w_sigma       # (tn, tk)

    # x (tm, tk) contracted with weight (tn, tk) over in_features -> (tm, tn).
    # Expressed as an 'NT' dot_general so Mosaic feeds the MXU directly
    # without materializing a transposed copy of the weight tile.
    acc_ref[...] += lax.dot_general(
        x_ref[...], weight,
        dimension_numbers=(((1,), (1,)), ((), ())),
        preferred_element_type=jnp.float32)

    # Epilogue: bias reparam + add + cast, only once per (i, j) output tile.
    @pl.when(k == pl.num_programs(2) - 1)
    def _():
        b_sigma = jnp.log1p(jnp.exp(b_rho_ref[...]))         # (1, tn)
        bias = b_mu_ref[...] + b_eps_ref[...] * b_sigma      # (1, tn)
        out_ref[...] = (acc_ref[...] + bias).astype(out_ref.dtype)


def bbb_linear_forward(x, w_mu, w_rho, w_eps, bias_mu, bias_rho, bias_eps,
                       *, tm=256, tn=512, tk=512):
    """BBBLinear probabilistic forward. Returns (output, kl)."""
    batch, in_features = x.shape
    out_features = w_mu.shape[0]

    # Clamp tiles to the (aligned) problem size; keep TPU-friendly minima.
    tm = min(tm, _round_up(batch, 8))
    tn = min(tn, _round_up(out_features, 128))
    tk = min(tk, _round_up(in_features, 128))

    mp = _round_up(batch, tm)
    np_ = _round_up(out_features, tn)
    kp = _round_up(in_features, tk)

    # Zero-pad to tile multiples. Padded K columns contribute exactly zero to
    # the contraction (mu = eps = 0 -> weight = 0); padded M rows / N columns
    # are sliced off the output.
    xp = jnp.pad(x, ((0, mp - batch), (0, kp - in_features)))
    pad_w = ((0, np_ - out_features), (0, kp - in_features))
    w_mu_p = jnp.pad(w_mu, pad_w)
    w_rho_p = jnp.pad(w_rho, pad_w)
    w_eps_p = jnp.pad(w_eps, pad_w)
    pad_b = (0, np_ - out_features)
    b_mu_p = jnp.pad(bias_mu, pad_b).reshape(1, np_)
    b_rho_p = jnp.pad(bias_rho, pad_b).reshape(1, np_)
    b_eps_p = jnp.pad(bias_eps, pad_b).reshape(1, np_)

    grid = (mp // tm, np_ // tn, kp // tk)

    out_padded = pl.pallas_call(
        _bbb_linear_kernel,
        out_shape=jax.ShapeDtypeStruct((mp, np_), x.dtype),
        grid_spec=pltpu.PrefetchScalarGridSpec(
            num_scalar_prefetch=0,
            grid=grid,
            in_specs=[
                pl.BlockSpec((tm, tk), lambda i, j, k: (i, k)),   # x
                pl.BlockSpec((tn, tk), lambda i, j, k: (j, k)),   # W_mu
                pl.BlockSpec((tn, tk), lambda i, j, k: (j, k)),   # W_rho
                pl.BlockSpec((tn, tk), lambda i, j, k: (j, k)),   # W_eps
                pl.BlockSpec((1, tn), lambda i, j, k: (0, j)),    # bias_mu
                pl.BlockSpec((1, tn), lambda i, j, k: (0, j)),    # bias_rho
                pl.BlockSpec((1, tn), lambda i, j, k: (0, j)),    # bias_eps
            ],
            out_specs=pl.BlockSpec((tm, tn), lambda i, j, k: (i, j)),
            scratch_shapes=[pltpu.VMEM((tm, tn), jnp.float32)],
        ),
        compiler_params=pltpu.CompilerParams(
            dimension_semantics=("parallel", "parallel", "arbitrary")),
    )(xp, w_mu_p, w_rho_p, w_eps_p, b_mu_p, b_rho_p, b_eps_p)

    out = out_padded[:batch, :out_features]
    kl = 0.0  # matches the PyTorch module (kl is the literal 0.0)
    return out, kl


def _reference_forward(x, w_mu, w_rho, w_eps, bias_mu, bias_rho, bias_eps):
    w_sigma = jnp.log1p(jnp.exp(w_rho))
    weight = w_mu + w_eps * w_sigma
    b_sigma = jnp.log1p(jnp.exp(bias_rho))
    bias = bias_mu + bias_eps * b_sigma
    return x @ weight.T + bias


def _make_inputs(key, batch, in_features, out_features):
    k_x, k_wmu, k_wrho, k_bmu, k_brho, k_weps, k_beps = jax.random.split(key, 7)
    # Deterministic parameter init matching reset_parameters():
    #   W_mu ~ N(0, 0.1), W_rho ~ N(-3, 0.1), bias_mu ~ N(0, 0.1), bias_rho ~ N(-3, 0.1)
    w_mu = 0.1 * jax.random.normal(k_wmu, (out_features, in_features), jnp.float32)
    w_rho = -3.0 + 0.1 * jax.random.normal(k_wrho, (out_features, in_features), jnp.float32)
    bias_mu = 0.1 * jax.random.normal(k_bmu, (out_features,), jnp.float32)
    bias_rho = -3.0 + 0.1 * jax.random.normal(k_brho, (out_features,), jnp.float32)
    # Per-forward standard-normal eps draws (reparameterization noise).
    w_eps = jax.random.normal(k_weps, (out_features, in_features), jnp.float32)
    bias_eps = jax.random.normal(k_beps, (out_features,), jnp.float32)
    x = jax.random.normal(k_x, (batch, in_features), jnp.float32)
    return x, w_mu, w_rho, w_eps, bias_mu, bias_rho, bias_eps


if __name__ == "__main__":
    key = jax.random.PRNGKey(0)
    k1, k2 = jax.random.split(key)

    # Test 1: tiny layer (single grid point after alignment).
    args1 = _make_inputs(k1, batch=8, in_features=32, out_features=32)
    out1, kl1 = bbb_linear_forward(*args1)
    out1 = jax.block_until_ready(out1)
    ref1 = _reference_forward(*args1)
    assert out1.shape == (8, 32)
    assert kl1 == 0.0
    assert jnp.allclose(out1, ref1, atol=1e-5, rtol=1e-5)

    # Test 2: non-aligned shapes + small tiles to exercise the (M, N, K) grid,
    # the K-accumulator, the bias epilogue and the zero-padding path.
    args2 = _make_inputs(k2, batch=10, in_features=200, out_features=144)
    out2, kl2 = bbb_linear_forward(*args2, tm=8, tn=128, tk=128)
    out2 = jax.block_until_ready(out2)
    ref2 = _reference_forward(*args2)
    assert out2.shape == (10, 144)
    assert kl2 == 0.0
    assert jnp.allclose(out2, ref2, atol=1e-4, rtol=1e-4)

    print("KERNEL_OK")
</pallas_src>

<mosaic_0001>
module attributes {stable_mosaic.version = 11 : i64} {
  func.func @_bbb_linear_kernel(%arg0: i32, %arg1: i32, %arg2: i32, %arg3: memref<8x128xf32, #tpu.memory_space<vmem>>, %arg4: memref<128x128xf32, #tpu.memory_space<vmem>>, %arg5: memref<128x128xf32, #tpu.memory_space<vmem>>, %arg6: memref<128x128xf32, #tpu.memory_space<vmem>>, %arg7: memref<1x128xf32, #tpu.memory_space<vmem>>, %arg8: memref<1x128xf32, #tpu.memory_space<vmem>>, %arg9: memref<1x128xf32, #tpu.memory_space<vmem>>, %arg10: memref<8x128xf32, #tpu.memory_space<vmem>>, %arg11: memref<8x128xf32, #tpu.memory_space<vmem>>) attributes {dimension_semantics = [#tpu.dimension_semantics<parallel>, #tpu.dimension_semantics<parallel>, #tpu.dimension_semantics<arbitrary>], iteration_bounds = array<i64: 1, 1, 1>, scalar_prefetch = 0 : i64, scratch_operands = 1 : i64, tpu.core_type = #tpu.core_type<tc>, window_params = [{transform_indices = @transform_0, window_bounds = array<i64: 8, 128>}, {transform_indices = @transform_1, window_bounds = array<i64: 128, 128>}, {transform_indices = @transform_2, window_bounds = array<i64: 128, 128>}, {transform_indices = @transform_3, window_bounds = array<i64: 128, 128>}, {transform_indices = @transform_4, window_bounds = array<i64: 1, 128>}, {transform_indices = @transform_5, window_bounds = array<i64: 1, 128>}, {transform_indices = @transform_6, window_bounds = array<i64: 1, 128>}, {transform_indices = @transform_7, window_bounds = array<i64: 8, 128>}]} {
    %c0_i32 = arith.constant 0 : i32
    %0 = arith.cmpi eq, %arg2, %c0_i32 : i32
    %1 = arith.extui %0 : i1 to i32
    %c0_i32_0 = arith.constant 0 : i32
    %2 = arith.cmpi ne, %1, %c0_i32_0 : i32
    scf.if %2 {
      %cst_14 = arith.constant 0.000000e+00 : f32
      %18 = vector.broadcast %cst_14 : f32 to vector<8x128xf32>
      %c0_15 = arith.constant 0 : index
      %c0_16 = arith.constant 0 : index
      %19 = vector.load %arg11[%c0_15, %c0_16] : memref<8x128xf32, #tpu.memory_space<vmem>>, vector<8x128xf32>
      tpu.vector_store %arg11[%c0_15, %c0_16], %18 {strides = array<i32>} : memref<8x128xf32, #tpu.memory_space<vmem>>, vector<8x128xf32>,
    } else {
    }
    %c0 = arith.constant 0 : index
    %c0_1 = arith.constant 0 : index
    %3 = vector.load %arg5[%c0, %c0_1] : memref<128x128xf32, #tpu.memory_space<vmem>>, vector<128x128xf32>
    %4 = math.exp %3 : vector<128x128xf32>
    %5 = math.log1p %4 : vector<128x128xf32>
    %c0_2 = arith.constant 0 : index
    %c0_3 = arith.constant 0 : index
    %6 = vector.load %arg4[%c0_2, %c0_3] : memref<128x128xf32, #tpu.memory_space<vmem>>, vector<128x128xf32>
    %c0_4 = arith.constant 0 : index
    %c0_5 = arith.constant 0 : index
    %7 = vector.load %arg6[%c0_4, %c0_5] : memref<128x128xf32, #tpu.memory_space<vmem>>, vector<128x128xf32>
    %8 = arith.mulf %7, %5 : vector<128x128xf32>
    %9 = arith.addf %6, %8 : vector<128x128xf32>
    %c0_6 = arith.constant 0 : index
    %c0_7 = arith.constant 0 : index
    %10 = vector.load %arg11[%c0_6, %c0_7] : memref<8x128xf32, #tpu.memory_space<vmem>>, vector<8x128xf32>
    %c0_8 = arith.constant 0 : index
    %c0_9 = arith.constant 0 : index
    %11 = vector.load %arg3[%c0_8, %c0_9] : memref<8x128xf32, #tpu.memory_space<vmem>>, vector<8x128xf32>
    %cst = arith.constant dense<0.000000e+00> : vector<8x128xf32>
    %12 = tpu.matmul %11, %9, %cst {dimension_numbers = #tpu.dot_dimension_numbers<[1], [1], [0], [0], [0, 0, 1, 0], [], []>} : vector<8x128xf32>, vector<128x128xf32>, vector<8x128xf32> -> vector<8x128xf32>
    %13 = arith.addf %10, %12 : vector<8x128xf32>
    %c0_10 = arith.constant 0 : index
    %c0_11 = arith.constant 0 : index
    %14 = vector.load %arg11[%c0_10, %c0_11] : memref<8x128xf32, #tpu.memory_space<vmem>>, vector<8x128xf32>
    tpu.vector_store %arg11[%c0_10, %c0_11], %13 {strides = array<i32>} : memref<8x128xf32, #tpu.memory_space<vmem>>, vector<8x128xf32>,
    %c0_i32_12 = arith.constant 0 : i32
    %15 = arith.cmpi eq, %arg2, %c0_i32_12 : i32
    %16 = arith.extui %15 : i1 to i32
    %c0_i32_13 = arith.constant 0 : i32
    %17 = arith.cmpi ne, %16, %c0_i32_13 : i32
    scf.if %17 {
      %c0_14 = arith.constant 0 : index
      %c0_15 = arith.constant 0 : index
      %18 = vector.load %arg8[%c0_14, %c0_15] : memref<1x128xf32, #tpu.memory_space<vmem>>, vector<1x128xf32>
      %19 = math.exp %18 : vector<1x128xf32>
      %20 = math.log1p %19 : vector<1x128xf32>
      %c0_16 = arith.constant 0 : index
      %c0_17 = arith.constant 0 : index
      %21 = vector.load %arg7[%c0_16, %c0_17] : memref<1x128xf32, #tpu.memory_space<vmem>>, vector<1x128xf32>
      %c0_18 = arith.constant 0 : index
      %c0_19 = arith.constant 0 : index
      %22 = vector.load %arg9[%c0_18, %c0_19] : memref<1x128xf32, #tpu.memory_space<vmem>>, vector<1x128xf32>
      %23 = arith.mulf %22, %20 : vector<1x128xf32>
      %24 = arith.addf %21, %23 : vector<1x128xf32>
      %c0_20 = arith.constant 0 : index
      %c0_21 = arith.constant 0 : index
      %25 = vector.load %arg11[%c0_20, %c0_21] : memref<8x128xf32, #tpu.memory_space<vmem>>, vector<8x128xf32>
      %26 = vector.broadcast %24 : vector<1x128xf32> to vector<8x128xf32>
      %27 = arith.addf %25, %26 : vector<8x128xf32>
      %c0_22 = arith.constant 0 : index
      %c0_23 = arith.constant 0 : index
      %28 = vector.load %arg10[%c0_22, %c0_23] : memref<8x128xf32, #tpu.memory_space<vmem>>, vector<8x128xf32>
      tpu.vector_store %arg10[%c0_22, %c0_23], %27 {strides = array<i32>} : memref<8x128xf32, #tpu.memory_space<vmem>>, vector<8x128xf32>,
    } else {
    }
    return
  }
  func.func @transform_0(%arg0: i32, %arg1: i32, %arg2: i32) -> (i32, i32) {
    %c0_i32 = arith.constant 0 : i32
    return %arg0, %arg2 : i32, i32
  }
  func.func @transform_1(%arg0: i32, %arg1: i32, %arg2: i32) -> (i32, i32) {
    %c0_i32 = arith.constant 0 : i32
    return %arg1, %arg2 : i32, i32
  }
  func.func @transform_2(%arg0: i32, %arg1: i32, %arg2: i32) -> (i32, i32) {
    %c0_i32 = arith.constant 0 : i32
    return %arg1, %arg2 : i32, i32
  }
  func.func @transform_3(%arg0: i32, %arg1: i32, %arg2: i32) -> (i32, i32) {
    %c0_i32 = arith.constant 0 : i32
    return %arg1, %arg2 : i32, i32
  }
  func.func @transform_4(%arg0: i32, %arg1: i32, %arg2: i32) -> (i32, i32) {
    %c0_i32 = arith.constant 0 : i32
    %c0_i32_0 = arith.constant 0 : i32
    return %c0_i32, %arg1 : i32, i32
  }
  func.func @transform_5(%arg0: i32, %arg1: i32, %arg2: i32) -> (i32, i32) {
    %c0_i32 = arith.constant 0 : i32
    %c0_i32_0 = arith.constant 0 : i32
    return %c0_i32, %arg1 : i32, i32
  }
  func.func @transform_6(%arg0: i32, %arg1: i32, %arg2: i32) -> (i32, i32) {
    %c0_i32 = arith.constant 0 : i32
    %c0_i32_0 = arith.constant 0 : i32
    return %c0_i32, %arg1 : i32, i32
  }
  func.func @transform_7(%arg0: i32, %arg1: i32, %arg2: i32) -> (i32, i32) {
    %c0_i32 = arith.constant 0 : i32
    return %arg0, %arg1 : i32, i32
  }
}

</mosaic_0001>

<bundles_post_ra>
// kernel: tpu_custom_call.1
= control target key start
LH: loop header
LB: loop body
LE: loop exit
PB: predicated region body
PF: predicated region fallthrough
CT: control target
= control target key end

     0   :  { %12 = vsyncpa [#allocation4], 0  ;;  %s1000_s0 = inlined_call_operand.hbm [shape: f32[8,128], index: 0, kind: input, shape index: {}]   ;;  %s1001_s1 = inlined_call_operand.hbm [shape: f32[128,128], index: 1, kind: input, shape index: {}]   ;;  %s1002_s2 = inlined_call_operand.hbm [shape: f32[128,128], index: 2, kind: input, shape index: {}]   ;;  %s1003_s3 = inlined_call_operand.hbm [shape: f32[128,128], index: 3, kind: input, shape index: {}]   ;;  %s1004_s4 = inlined_call_operand.vmem [shape: f32[1,128], index: 4, kind: input, shape index: {}]   ;;  %s1005_s5 = inlined_call_operand.vmem [shape: f32[1,128], index: 5, kind: input, shape index: {}]   ;;  %s1006_s6 = inlined_call_operand.vmem [shape: f32[1,128], index: 6, kind: input, shape index: {}]   ;;  %s1007_s7 = inlined_call_operand.hbm [shape: f32[8,128], index: 7, kind: output, shape index: {}]  }
   0x1   :  { %13 = vsyncpa [#allocation7], 0 }
   0x2   :  { %14 = vsyncpa [#allocation10], 0 }
   0x3   :  { %15 = vsyncpa [#allocation5], 0  ;;  %s732_s24 = smov [#allocation6]   ;;  %s614_s28 = scalar_lea.hbm %s1001_s1, 2048 }
   0x4   :  { %s31_s25 = sshll.u32 %s732_s24, 4  ;;  %p615_p0 = scmp.ne.s32.totalorder %s1001_s1, %s614_s28  ;;  %s32_s25 = int_to_ptr.vmem [resolvable:$true] %s31_s25 }
   0x5   :  { %p618_p1 = scmp.lt.u32.totalorder %s614_s28, %s1001_s1 }
   0x7   :  { %p620_p2 = pnand %p618_p1, %p615_p0 }
   0x9   :  { %623 = shalt.err (!%p620_p2)
}
   0xa   :  { %s624_s10 = scalar_lea.vmem %s32_s25, 2048  ;;  %p629_p4 = scmp.lt.s32.totalorder %s32_s25, %s32_s25 }
   0xb   :  { %p625_p3 = scmp.ne.s32.totalorder %s32_s25, %s624_s10  ;;  %p630_p5 = scmp.lt.s32.totalorder %s624_s10, %s624_s10 }
   0xd   :  { %p631_p6 = por %p630_p5, %p629_p4 }
   0xf   :  { %p632_p7 = pnand %p631_p6, %p625_p3 }
  0x11   :  { %635 = shalt.err (!%p632_p7)
}
  0x12   :  { %s733_s11 = smov 128   ;;  %s734_s12 = smov 8  }
  0x13   :  { %37 = dma.hbm_to_vmem [thread:$0]  %s1001_s1, 2048, %s32_s25, [#allocation7], %s733_s11, %s733_s11, %s734_s12  }
  0x14   :  { %s735_s15 = smov [#allocation3]   ;;  %s736_s17 = smov [#allocation8]  }
  0x15   :  { %s22_s16 = sshll.u32 %s735_s15, 4  ;;  %s43_s18 = sshll.u32 %s736_s17, 4  ;;  %s23_s16 = int_to_ptr.vmem [resolvable:$true] %s22_s16  ;;  %s44_s18 = int_to_ptr.vmem [resolvable:$true] %s43_s18 }
  0x16   :  { %s636_s21 = scalar_lea.hbm %s1000_s0, 128 }
  0x17   :  { %p637_p8 = scmp.ne.s32.totalorder %s1000_s0, %s636_s21  ;;  %p640_p9 = scmp.lt.u32.totalorder %s636_s21, %s1000_s0 }
  0x19   :  { %p642_p10 = pnand %p640_p9, %p637_p8 }
  0x1b   :  { %645 = shalt.err (!%p642_p10)
}
  0x1c   :  { %s646_s1 = scalar_lea.vmem %s23_s16, 128  ;;  %p651_p12 = scmp.lt.s32.totalorder %s23_s16, %s23_s16 }
  0x1d   :  { %p647_p11 = scmp.ne.s32.totalorder %s23_s16, %s646_s1  ;;  %p652_p13 = scmp.lt.s32.totalorder %s646_s1, %s646_s1 }
  0x1f   :  { %p653_p0 = por %p652_p13, %p651_p12 }
  0x21   :  { %p654_p1 = pnand %p653_p0, %p647_p11 }
  0x23   :  { %657 = shalt.err (!%p654_p1)
}
  0x24   :  { %25 = dma.hbm_to_vmem [thread:$0]  %s1000_s0, 128, %s23_s16, [#allocation4]  }
  0x25   :  { %s658_s30 = scalar_lea.hbm %s1002_s2, 2048 }
  0x26   :  { %p659_p2 = scmp.ne.s32.totalorder %s1002_s2, %s658_s30  ;;  %p662_p3 = scmp.lt.u32.totalorder %s658_s30, %s1002_s2 }
  0x28   :  { %p664_p4 = pnand %p662_p3, %p659_p2 }
  0x2a   :  { %667 = shalt.err (!%p664_p4)
}
  0x2b   :  { %s668_s14 = scalar_lea.vmem %s44_s18, 2048  ;;  %p673_p6 = scmp.lt.s32.totalorder %s44_s18, %s44_s18 }
  0x2c   :  { %p669_p5 = scmp.ne.s32.totalorder %s44_s18, %s668_s14  ;;  %p674_p7 = scmp.lt.s32.totalorder %s668_s14, %s668_s14 }
  0x2e   :  { %p675_p8 = por %p674_p7, %p673_p6 }
  0x30   :  { %p676_p9 = pnand %p675_p8, %p669_p5 }
  0x32   :  { %679 = shalt.err (!%p676_p9)
}
  0x33   :  { %49 = dma.hbm_to_vmem [thread:$0]  %s1002_s2, 2048, %s44_s18, [#allocation7], %s733_s11, %s733_s11, %s734_s12  }
  0x34   :  { %s737_s16 = smov [#allocation9]   ;;  %s680_s21 = scalar_lea.hbm %s1003_s3, 2048 }
  0x35   :  { %s55_s17 = sshll.u32 %s737_s16, 4  ;;  %p681_p10 = scmp.ne.s32.totalorder %s1003_s3, %s680_s21  ;;  %s56_s17 = int_to_ptr.vmem [resolvable:$true] %s55_s17 }
  0x36   :  { %p684_p11 = scmp.lt.u32.totalorder %s680_s21, %s1003_s3 }
  0x38   :  { %p686_p12 = pnand %p684_p11, %p681_p10 }
  0x3a   :  { %689 = shalt.err (!%p686_p12)
}
  0x3b   :  { %s690_s1 = scalar_lea.vmem %s56_s17, 2048  ;;  %p695_p0 = scmp.lt.s32.totalorder %s56_s17, %s56_s17 }
  0x3c   :  { %p691_p13 = scmp.ne.s32.totalorder %s56_s17, %s690_s1  ;;  %p696_p1 = scmp.lt.s32.totalorder %s690_s1, %s690_s1 }
  0x3e   :  { %p697_p2 = por %p696_p1, %p695_p0 }
  0x40   :  { %p698_p3 = pnand %p697_p2, %p691_p13 }
  0x42   :  { %701 = shalt.err (!%p698_p3)
}
  0x43   :  { %61 = dma.hbm_to_vmem [thread:$0]  %s1003_s3, 2048, %s56_s17, [#allocation10], %s733_s11, %s733_s11, %s734_s12  }
  0x44   :  { %724 = dma.done.wait [#allocation4], 128  }
  0x45   :  { %725 = vsyncadd [#allocation4], 4294967168 }
  0x46   :  { %726 = dma.done.wait [#allocation7], 4096  }
  0x47   :  { %727 = vsyncadd [#allocation7], 4294963200 }
  0x48   :  { %728 = dma.done.wait [#allocation10], 2048  }
  0x49   :  { %729 = vsyncadd [#allocation10], 4294965248  ;;  %v738_v0 = vmov 0.0|0.0   ;;  %vm739_vm0 = vmmov 0   ;;  %v740_v1 = vmov 0.0   ;;  %v85_v2 = vld [vmem:[#allocation8] sm:$0xff] }
  0x4a   :  { %512 = vmatprep.subr.bf16.mxu0 %v738_v0  ;;  %509 = vmatprep.mubr.msk.f32.mxu0 %vm739_vm0, %v740_v1  ;;  %v86_v3 = vld [vmem:[#allocation8 + $0x8] sm:$0xff]  ;;  %v101_v4 = vmul.f32 1.442695, %v85_v2  ;;  %v87_v6 = vld [vmem:[#allocation8 + $0x10] sm:$0xff]  ;;  %v88_v7 = vld [vmem:[#allocation8 + $0x18] sm:$0xff]  ;;  %s741_s28 = smov [#allocation11]  }
  0x4b   :  { %v103_v5 = vmul.f32 1.442695, %v86_v3  ;;  %v105_v8 = vmul.f32 1.442695, %v87_v6  ;;  %v107_v9 = vmul.f32 1.442695, %v88_v7 }
  0x4c   :  { %546 = vpow2.f32 %v101_v4  ;;  %v89_v10 = vld [vmem:[#allocation8 + $0x20] sm:$0xff]  ;;  %v90_v11 = vld [vmem:[#allocation8 + $0x28] sm:$0xff]  ;;  %v91_v14 = vld [vmem:[#allocation8 + $0x30] sm:$0xff]  ;;  %s449_s29 = sshll.u32 %s741_s28, 4  ;;  %s450_s29 = int_to_ptr.vmem [resolvable:$true] %s449_s29 }
  0x4d   :  { %548 = vpow2.f32 %v103_v5  ;;  %v109_v12 = vmul.f32 1.442695, %v89_v10  ;;  %v111_v13 = vmul.f32 1.442695, %v90_v11  ;;  %v92_v15 = vld [vmem:[#allocation8 + $0x38] sm:$0xff]  ;;  %v93_v18 = vld [vmem:[#allocation8 + $0x40] sm:$0xff]  ;;  %p707_p5 = scmp.lt.s32.totalorder %s450_s29, %s450_s29 }
  0x4e   :  { %550 = vpow2.f32 %v105_v8  ;;  %v113_v16 = vmul.f32 1.442695, %v91_v14  ;;  %v115_v17 = vmul.f32 1.442695, %v92_v15  ;;  %v117_v19 = vmul.f32 1.442695, %v93_v18 }
  0x4f   :  { %552 = vpow2.f32 %v107_v9  ;;  %v94_v20 = vld [vmem:[#allocation8 + $0x48] sm:$0xff]  ;;  %v95_v29 = vld [vmem:[#allocation8 + $0x50] sm:$0xff]  ;;  %v96_v32 = vld [vmem:[#allocation8 + $0x58] sm:$0xff]  ;;  %s702_s30 = scalar_lea.vmem %s450_s29, 128 }
  0x50   :  { %554 = vpow2.f32 %v109_v12  ;;  %v119_v26 = vmul.f32 1.442695, %v94_v20  ;;  %v121_v37 = vmul.f32 1.442695, %v95_v29  ;;  %v123_v39 = vmul.f32 1.442695, %v96_v32  ;;  %p703_p4 = scmp.ne.s32.totalorder %s450_s29, %s702_s30  ;;  %p708_p6 = scmp.lt.s32.totalorder %s702_s30, %s702_s30 }
  0x51   :  { %556 = vpow2.f32 %v111_v13  ;;  %v97_v44 = vld [vmem:[#allocation8 + $0x60] sm:$0xff]  ;;  %v294_v4 = vld [vmem:[#allocation9 + $0x8] sm:$0xff] }
  0x52   :  { %558 = vpow2.f32 %v113_v16  ;;  %v125_v54 = vmul.f32 1.442695, %v97_v44  ;;  %v293_v63 = vld [vmem:[#allocation9] sm:$0xff]  ;;  %v278_v20 = vld [vmem:[#allocation6 + $0x8] sm:$0xff]  ;;  %v280_v44 = vld [vmem:[#allocation6 + $0x18] sm:$0xff]  ;;  %p709_p7 = por %p708_p6, %p707_p5 }
  0x53   :  { %560 = vpow2.f32 %v115_v17  ;;  %v277_v14 = vld [vmem:[#allocation6] sm:$0xff]  ;;  %v295_v17 = vld [vmem:[#allocation9 + $0x10] sm:$0xff] }
  0x54   :  { %562 = vpow2.f32 %v117_v19  ;;  %p710_p8 = pnand %p709_p7, %p703_p4 }
  0x56   :  { %v547_v21 = vpop.eup %546 }
  0x57   :  { %v549_v22 = vpop.eup %548  ;;  %v133_v23 = vadd.f32 1.0, %v547_v21  ;;  %v136_v31 = vmul.f32 -0.5, %v547_v21  ;;  %v139_v42 = vand.u32 2147483647, %v547_v21 }
  0x58   :  { %v551_v24 = vpop.eup %550  ;;  %v142_v25 = vadd.f32 1.0, %v549_v22  ;;  %v145_v33 = vmul.f32 -0.5, %v549_v22  ;;  %v148_v47 = vand.u32 2147483647, %v549_v22 }
  0x59   :  { %v553_v27 = vpop.eup %552  ;;  %564 = vlog2.f32 %v133_v23  ;;  %v151_v28 = vadd.f32 1.0, %v551_v24  ;;  %v154_v36 = vmul.f32 -0.5, %v551_v24  ;;  %v137_v41 = vadd.f32 1.0, %v136_v31 }
  0x5a   :  { %v840_v30 = vpop.eup %554  ;;  %566 = vlog2.f32 %v142_v25  ;;  %v160_v34 = vadd.f32 1.0, %v553_v27  ;;  %v163_v43 = vmul.f32 -0.5, %v553_v27  ;;  %v146_v46 = vadd.f32 1.0, %v145_v33 }
  0x5b   :  { %568 = vlog2.f32 %v151_v28  ;;  %v842_v35 = vpop.eup %556  ;;  %v169_v38 = vadd.f32 1.0, %v840_v30  ;;  %v155_v49 = vadd.f32 1.0, %v154_v36  ;;  %v157_v50 = vand.u32 2147483647, %v551_v24  ;;  %v296_v28 = vld [vmem:[#allocation9 + $0x18] sm:$0xff] }
  0x5c   :  { %570 = vpow2.f32 %v119_v26  ;;  %v845_v40 = vpop.eup %558  ;;  %v178_v48 = vadd.f32 1.0, %v842_v35  ;;  %v172_v51 = vmul.f32 -0.5, %v840_v30  ;;  %v166_v52 = vand.u32 2147483647, %v553_v27 }
  0x5d   :  { %572 = vlog2.f32 %v160_v34  ;;  %v847_v45 = vpop.eup %560  ;;  %v187_v53 = vadd.f32 1.0, %v845_v40  ;;  %v138_v56 = vmul.f32 %v547_v21, %v137_v41  ;;  %v164_v57 = vadd.f32 1.0, %v163_v43  ;;  %v279_v43 = vld [vmem:[#allocation6 + $0x10] sm:$0xff] }
  0x5e   :  { %574 = vlog2.f32 %v169_v38  ;;  %v852_v55 = vpop.eup %562  ;;  %v196_v58 = vadd.f32 1.0, %v847_v45  ;;  %vm855_vm1 = vcmp.lt.f32.partialorder %v139_v42, 0.0004427343  ;;  %v147_v61 = vmul.f32 %v549_v22, %v146_v46 }
  0x5f   :  { %576 = vpow2.f32 %v121_v37  ;;  %vm859_vm2 = vcmp.lt.f32.partialorder %v148_v47, 0.0004427343  ;;  %v181_v1 = vmul.f32 -0.5, %v842_v35  ;;  %v156_v5 = vmul.f32 %v551_v24, %v155_v49 }
  0x60   :  { %578 = vlog2.f32 %v178_v48  ;;  %vm864_vm3 = vcmp.lt.f32.partialorder %v157_v50, 0.0004427343  ;;  %v173_v7 = vadd.f32 1.0, %v172_v51  ;;  %vm868_vm4 = vcmp.lt.f32.partialorder %v166_v52, 0.0004427343 }
  0x61   :  { %580 = vpow2.f32 %v123_v39  ;;  %v175_v11 = vand.u32 2147483647, %v840_v30  ;;  %v165_v16 = vmul.f32 %v553_v27, %v164_v57  ;;  %v182_v22 = vadd.f32 1.0, %v181_v1 }
  0x62   :  { %582 = vlog2.f32 %v187_v53  ;;  %v184_v23 = vand.u32 2147483647, %v842_v35  ;;  %v174_v29 = vmul.f32 %v840_v30, %v173_v7  ;;  %v190_v33 = vmul.f32 -0.5, %v845_v40 }
  0x63   :  { %v565_v59 = vpop.eup %564  ;;  %584 = vlog2.f32 %v196_v58  ;;  %v205_v34 = vadd.f32 1.0, %v852_v55  ;;  %vm890_vm5 = vcmp.lt.f32.partialorder %v175_v11, 0.0004427343  ;;  %v183_v47 = vmul.f32 %v842_v35, %v182_v22  ;;  %v297_v35 = vld [vmem:[#allocation9 + $0x20] sm:$0xff]  ;;  %v98_v11 = vld [vmem:[#allocation8 + $0x68] sm:$0xff] }
  0x64   :  { %v567_v2 = vpop.eup %566  ;;  %v135_v3 = vmul.f32 0.6931472, %v565_v59  ;;  %v199_v48 = vmul.f32 -0.5, %v847_v45  ;;  %vm898_vm6 = vcmp.lt.f32.partialorder %v184_v23, 0.0004427343  ;;  %586 = vpow2.f32 %v125_v54 }
  0x65   :  { %v569_v8 = vpop.eup %568  ;;  %v144_v9 = vmul.f32 0.6931472, %v567_v2  ;;  %v191_v53 = vadd.f32 1.0, %v190_v33  ;;  %588 = vlog2.f32 %v205_v34  ;;  %v193_v62 = vand.u32 2147483647, %v845_v40 }
  0x66   :  { %v873_v12 = vpop.eup %570  ;;  %v141_v13 = vsel %vm855_vm1, %v138_v56, %v135_v3  ;;  %v153_v15 = vmul.f32 0.6931472, %v569_v8  ;;  %v200_v54 = vadd.f32 1.0, %v199_v48  ;;  %v202_v1 = vand.u32 2147483647, %v847_v45 }
  0x67   :  { %v573_v18 = vpop.eup %572  ;;  %v150_v19 = vsel %vm859_vm2, %v147_v61, %v144_v9  ;;  %v309_v21 = vmul.f32 %v293_v63, %v141_v13  ;;  %v214_v41 = vadd.f32 1.0, %v873_v12  ;;  %v298_v61 = vld [vmem:[#allocation9 + $0x28] sm:$0xff]  ;;  %v208_v2 = vmul.f32 -0.5, %v852_v55  ;;  %v281_v13 = vld [vmem:[#allocation6 + $0x20] sm:$0xff] }
  0x68   :  { %v310_v24 = vmul.f32 %v294_v4, %v150_v19  ;;  %v159_v25 = vsel %vm864_vm3, %v156_v5, %v153_v15  ;;  %v162_v26 = vmul.f32 0.6931472, %v573_v18  ;;  %v575_v27 = vpop.eup %574  ;;  %v192_v4 = vmul.f32 %v845_v40, %v191_v53 }
  0x69   :  { %v325_v31 = vadd.f32 %v309_v21, %v277_v14  ;;  %v311_v32 = vmul.f32 %v295_v17, %v159_v25  ;;  %v885_v36 = vpop.eup %576  ;;  %v171_v39 = vmul.f32 0.6931472, %v575_v27  ;;  %590 = vlog2.f32 %v214_v41  ;;  %v282_v14 = vld [vmem:[#allocation6 + $0x28] sm:$0xff]  ;;  %v99_v21 = vld [vmem:[#allocation8 + $0x70] sm:$0xff]  ;;  %v300_v27 = vld [vmem:[#allocation9 + $0x38] sm:$0xff] }
  0x6a   :  { %v326_v37 = vadd.f32 %v310_v24, %v278_v20  ;;  %v168_v38 = vsel %vm868_vm4, %v165_v16, %v162_v26  ;;  %v579_v42 = vpop.eup %578  ;;  %v217_v5 = vmul.f32 -0.5, %v873_v12  ;;  %v223_v6 = vadd.f32 1.0, %v885_v36  ;;  %v299_v26 = vld [vmem:[#allocation9 + $0x30] sm:$0xff] }
  0x6b   :  { %v312_v30 = vmul.f32 %v296_v28, %v168_v38  ;;  %v896_v49 = vpop.eup %580  ;;  %v180_v51 = vmul.f32 0.6931472, %v579_v42  ;;  %v327_v56 = vadd.f32 %v311_v32, %v279_v43  ;;  %v177_v58 = vsel %vm890_vm5, %v174_v29, %v171_v39 }
  0x6c   :  { %v513_v50 = vpack.c.bf16 %v326_v37, %v325_v31  ;;  %v583_v59 = vpop.eup %582  ;;  %v313_v3 = vmul.f32 %v297_v35, %v177_v58  ;;  %v232_v10 = vadd.f32 1.0, %v896_v49  ;;  %vm914_vm7 = vcmp.lt.f32.partialorder %v193_v62, 0.0004427343 }
  0x6d   :  { %v328_v57 = vadd.f32 %v312_v30, %v280_v44  ;;  %v186_v60 = vsel %vm898_vm6, %v183_v47, %v180_v51  ;;  %v585_v63 = vpop.eup %584  ;;  %v189_v9 = vmul.f32 0.6931472, %v583_v59  ;;  %v201_v17 = vmul.f32 %v847_v45, %v200_v54  ;;  %v100_v45 = vld [vmem:[#allocation8 + $0x78] sm:$0xff]  ;;  %v283_v44 = vld [vmem:[#allocation6 + $0x30] sm:$0xff]  ;;  %v301_v59 = vld [vmem:[#allocation9 + $0x40] sm:$0xff] }
  0x6e   :  { %514 = vmatpush3.bf16.xpose.msra.mxu0 %v513_v50  ;;  %v314_v8 = vmul.f32 %v298_v61, %v186_v60  ;;  %v198_v16 = vmul.f32 0.6931472, %v585_v63  ;;  %vm919_vm8 = vcmp.lt.f32.partialorder %v202_v1, 0.0004427343  ;;  %v209_v18 = vadd.f32 1.0, %v208_v2  ;;  %v923_v22 = vpop.eup %586  ;;  %v284_v47 = vld [vmem:[#allocation6 + $0x38] sm:$0xff] }
  0x6f   :  { %515 = vmatprep.subr.bf16.mxu0 %v738_v0  ;;  %v516_v7 = vpack.c.bf16 %v328_v57, %v327_v56  ;;  %v218_v19 = vadd.f32 1.0, %v217_v5  ;;  %592 = vlog2.f32 %v223_v6  ;;  %v127_v20 = vmul.f32 1.442695, %v98_v11  ;;  %v589_v28 = vpop.eup %588  ;;  %v302_v60 = vld [vmem:[#allocation9 + $0x48] sm:$0xff] }
  0x70   :  { %v329_v23 = vadd.f32 %v313_v3, %v281_v13  ;;  %v330_v24 = vadd.f32 %v314_v8, %v282_v14  ;;  %v195_v25 = vsel %vm914_vm7, %v192_v4, %v189_v9  ;;  %594 = vlog2.f32 %v232_v10  ;;  %v285_v4 = vld [vmem:[#allocation6 + $0x40] sm:$0xff]  ;;  %v286_v8 = vld [vmem:[#allocation6 + $0x48] sm:$0xff] }
  0x71   :  { %v204_v29 = vsel %vm919_vm8, %v201_v17, %v198_v16  ;;  %596 = vpow2.f32 %v127_v20  ;;  %v210_v32 = vmul.f32 %v852_v55, %v209_v18  ;;  %v211_v33 = vand.u32 2147483647, %v852_v55 }
  0x72   :  { %v220_v34 = vand.u32 2147483647, %v873_v12  ;;  %v129_v37 = vmul.f32 1.442695, %v99_v21  ;;  %v315_v38 = vmul.f32 %v299_v26, %v195_v25  ;;  %v219_v39 = vmul.f32 %v873_v12, %v218_v19 }
  0x73   :  { %v591_v31 = vpop.eup %590  ;;  %v226_v41 = vmul.f32 -0.5, %v885_v36  ;;  %v131_v42 = vmul.f32 1.442695, %v100_v45  ;;  %v519_v43 = vpack.c.bf16 %v330_v24, %v329_v23  ;;  %v316_v30 = vmul.f32 %v300_v27, %v204_v29  ;;  %v303_v23 = vld [vmem:[#allocation9 + $0x50] sm:$0xff]  ;;  %v304_v24 = vld [vmem:[#allocation9 + $0x58] sm:$0xff] }
  0x74   :  { %v241_v46 = vadd.f32 1.0, %v923_v22  ;;  %598 = vpow2.f32 %v129_v37  ;;  %v207_v48 = vmul.f32 0.6931472, %v589_v28  ;;  %v216_v50 = vmul.f32 0.6931472, %v591_v31 }
  0x75   :  { %v235_v55 = vmul.f32 -0.5, %v896_v49  ;;  %600 = vpow2.f32 %v131_v42  ;;  %vm937_vm9 = vcmp.lt.f32.partialorder %v211_v33, 0.0004427343  ;;  %vm941_vm10 = vcmp.lt.f32.partialorder %v220_v34, 0.0004427343  ;;  %v287_v33 = vld [vmem:[#allocation6 + $0x50] sm:$0xff] }
  0x76   :  { %517 = vmatpush3.bf16.xpose.msra.mxu0 %v516_v7  ;;  %v227_v52 = vadd.f32 1.0, %v226_v41  ;;  %v331_v53 = vadd.f32 %v315_v38, %v283_v44  ;;  %v332_v56 = vadd.f32 %v316_v30, %v284_v47  ;;  %602 = vlog2.f32 %v241_v46  ;;  %v288_v34 = vld [vmem:[#allocation6 + $0x58] sm:$0xff] }
  0x77   :  { %518 = vmatprep.subr.bf16.mxu0 %v738_v0  ;;  %v213_v58 = vsel %vm937_vm9, %v210_v32, %v207_v48  ;;  %v222_v35 = vsel %vm941_vm10, %v219_v39, %v216_v50  ;;  %v236_v61 = vadd.f32 1.0, %v235_v55  ;;  %v229_v54 = vand.u32 2147483647, %v885_v36  ;;  %v305_v50 = vld [vmem:[#allocation9 + $0x60] sm:$0xff] }
  0x78   :  { %v238_v63 = vand.u32 2147483647, %v896_v49  ;;  %v228_v2 = vmul.f32 %v885_v36, %v227_v52  ;;  %v522_v3 = vpack.c.bf16 %v332_v56, %v331_v53  ;;  %v317_v5 = vmul.f32 %v301_v59, %v213_v58 }
  0x79   :  { %v593_v57 = vpop.eup %592  ;;  %v318_v6 = vmul.f32 %v302_v60, %v222_v35  ;;  %v237_v11 = vmul.f32 %v896_v49, %v236_v61  ;;  %v244_v13 = vmul.f32 -0.5, %v923_v22  ;;  %vm955_vm11 = vcmp.lt.f32.partialorder %v229_v54, 0.0004427343  ;;  %v289_v60 = vld [vmem:[#allocation6 + $0x60] sm:$0xff]  ;;  %v290_v61 = vld [vmem:[#allocation6 + $0x68] sm:$0xff] }
  0x7a   :  { %v595_v62 = vpop.eup %594  ;;  %v225_v9 = vmul.f32 0.6931472, %v593_v57  ;;  %vm959_vm12 = vcmp.lt.f32.partialorder %v238_v63, 0.0004427343  ;;  %v333_v18 = vadd.f32 %v317_v5, %v285_v4  ;;  %v247_v45 = vand.u32 2147483647, %v923_v22 }
  0x7b   :  { %v597_v1 = vpop.eup %596  ;;  %v234_v10 = vmul.f32 0.6931472, %v595_v62  ;;  %v334_v19 = vadd.f32 %v318_v6, %v286_v8  ;;  %v245_v25 = vadd.f32 1.0, %v244_v13  ;;  %v307_v6 = vld [vmem:[#allocation9 + $0x70] sm:$0xff]  ;;  %v292_v13 = vld [vmem:[#allocation6 + $0x78] sm:$0xff] }
  0x7c   :  { %v250_v7 = vadd.f32 1.0, %v597_v1  ;;  %v253_v17 = vmul.f32 -0.5, %v597_v1  ;;  %v231_v49 = vsel %vm955_vm11, %v228_v2, %v225_v9  ;;  %v256_v32 = vand.u32 2147483647, %v597_v1 }
  0x7d   :  { %v240_v21 = vsel %vm959_vm12, %v237_v11, %v234_v10  ;;  %v525_v29 = vpack.c.bf16 %v334_v19, %v333_v18  ;;  %v319_v27 = vmul.f32 %v303_v23, %v231_v49  ;;  %v246_v38 = vmul.f32 %v923_v22, %v245_v25  ;;  %v306_v22 = vld [vmem:[#allocation9 + $0x68] sm:$0xff]  ;;  %v291_v11 = vld [vmem:[#allocation6 + $0x70] sm:$0xff] }
  0x7e   :  { %520 = vmatpush3.bf16.xpose.msra.mxu0 %v519_v43  ;;  %v599_v14 = vpop.eup %598  ;;  %604 = vlog2.f32 %v250_v7  ;;  %v254_v28 = vadd.f32 1.0, %v253_v17  ;;  %v320_v31 = vmul.f32 %v304_v24, %v240_v21  ;;  %vm970_vm13 = vcmp.lt.f32.partialorder %v247_v45, 0.0004427343  ;;  %v308_v7 = vld [vmem:[#allocation9 + $0x78] sm:$0xff] }
  0x7f   :  { %521 = vmatprep.subr.bf16.mxu0 %v738_v0  ;;  %v601_v36 = vpop.eup %600  ;;  %v259_v40 = vadd.f32 1.0, %v599_v14  ;;  %v262_v39 = vmul.f32 -0.5, %v599_v14  ;;  %v335_v30 = vadd.f32 %v319_v27, %v287_v33  ;;  %vm257_vm14 = vcmp.lt.f32.partialorder %v256_v32, 0.0004427343  ;;  %v418_v17 = vld [vmem:[%s1005_s5] sm:$0x1] }
  0x80   :  { %v268_v20 = vadd.f32 1.0, %v601_v36  ;;  %v603_v26 = vpop.eup %602  ;;  %v271_v41 = vmul.f32 -0.5, %v601_v36  ;;  %v255_v43 = vmul.f32 %v597_v1, %v254_v28  ;;  %v336_v46 = vadd.f32 %v320_v31, %v288_v34  ;;  %v431_v45 = vld [vmem:[%s1006_s6] sm:$0x1] }
  0x81   :  { %606 = vlog2.f32 %v259_v40  ;;  %v243_v37 = vmul.f32 0.6931472, %v603_v26  ;;  %v263_v55 = vadd.f32 1.0, %v262_v39  ;;  %v265_v12 = vand.u32 2147483647, %v599_v14 }
  0x82   :  { %608 = vlog2.f32 %v268_v20  ;;  %v272_v51 = vadd.f32 1.0, %v271_v41  ;;  %v274_v52 = vand.u32 2147483647, %v601_v36  ;;  %v528_v58 = vpack.c.bf16 %v336_v46, %v335_v30  ;;  %v430_v27 = vld [vmem:[%s1004_s4] sm:$0x1] }
  0x83   :  { %v249_v47 = vsel %vm970_vm13, %v246_v38, %v243_v37  ;;  %v264_v54 = vmul.f32 %v599_v14, %v263_v55  ;;  %vm266_vm15 = vcmp.lt.f32.partialorder %v265_v12, 0.0004427343  ;;  %v419_v40 = vmul.f32 1.442695, %v418_v17 }
  0x84   :  { %v321_v35 = vmul.f32 %v305_v50, %v249_v47  ;;  %v273_v1 = vmul.f32 %v601_v36, %v272_v51  ;;  %vm275_vm0 = vcmp.lt.f32.partialorder %v274_v52, 0.0004427343  ;;  %v342_v36 = vld [vmem:[#allocation3] sm:$0xff] }
  0x85   :  { %610 = vpow2.f32 %v419_v40 }
  0x86   :  { %523 = vmatpush3.bf16.xpose.msra.mxu0 %v522_v3  ;;  %v337_v2 = vadd.f32 %v321_v35, %v289_v60 }
  0x87   :  { %524 = vmatprep.subr.bf16.mxu0 %v738_v0 }
  0x88   :  { %v605_v44 = vpop.eup %604 }
  0x89   :  { %v252_v48 = vmul.f32 0.6931472, %v605_v44 }
  0x8b   :  { %v607_v53 = vpop.eup %606  ;;  %v258_v56 = vsel %vm257_vm14, %v255_v43, %v252_v48 }
  0x8c   :  { %v609_v57 = vpop.eup %608  ;;  %v322_v59 = vmul.f32 %v306_v22, %v258_v56  ;;  %v261_v62 = vmul.f32 0.6931472, %v607_v53 }
  0x8d   :  { %v270_v63 = vmul.f32 0.6931472, %v609_v57 }
  0x8e   :  { %526 = vmatpush3.bf16.xpose.msra.mxu0 %v525_v29  ;;  %v338_v3 = vadd.f32 %v322_v59, %v290_v61  ;;  %v267_v4 = vsel %vm266_vm15, %v264_v54, %v261_v62 }
  0x8f   :  { %527 = vmatprep.subr.bf16.mxu0 %v738_v0  ;;  %v276_v5 = vsel %vm275_vm0, %v273_v1, %v270_v63  ;;  %v323_v9 = vmul.f32 %v307_v6, %v267_v4  ;;  %v611_v18 = vpop.eup %610 }
  0x90   :  { %v531_v8 = vpack.c.bf16 %v338_v3, %v337_v2  ;;  %v324_v10 = vmul.f32 %v308_v7, %v276_v5  ;;  %v421_v19 = vadd.f32 1.0, %v611_v18  ;;  %v424_v20 = vmul.f32 -0.5, %v611_v18 }
  0x91   :  { %v339_v14 = vadd.f32 %v323_v9, %v291_v11  ;;  %v427_v23 = vand.u32 2147483647, %v611_v18 }
  0x92   :  { %v340_v15 = vadd.f32 %v324_v10, %v292_v13  ;;  %612 = vlog2.f32 %v421_v19  ;;  %v425_v49 = vadd.f32 1.0, %v424_v20 }
  0x93   :  { %vm428_vm1 = vcmp.lt.f32.partialorder %v427_v23, 0.0004427343 }
  0x94   :  { %v534_v16 = vpack.c.bf16 %v340_v15, %v339_v14  ;;  %v426_v25 = vmul.f32 %v611_v18, %v425_v49 }
  0x96   :  { %529 = vmatpush3.bf16.xpose.msra.mxu0 %v528_v58 }
  0x97   :  { %530 = vmatprep.subr.bf16.mxu0 %v738_v0 }
  0x9c   :  { %v613_v21 = vpop.eup %612 }
  0x9d   :  { %v423_v24 = vmul.f32 0.6931472, %v613_v21 }
  0x9e   :  { %532 = vmatpush3.bf16.xpose.msra.mxu0 %v531_v8 }
  0x9f   :  { %533 = vmatprep.subr.bf16.mxu0 %v738_v0  ;;  %v436_v0 = vlaneseq  ;;  %v429_v26 = vsel %vm428_vm1, %v426_v25, %v423_v24 }
  0xa0   :  { %v432_v28 = vmul.f32 %v431_v45, %v429_v26 }
  0xa1   :  { %v437_v29 = vshrl.u32 %v436_v0, 7 }
  0xa2   :  { %v433_v31 = vadd.f32 %v432_v28, %v430_v27 }
  0xa3   :  { %v438_v32 = vsub.s32 0, %v437_v29 }
  0xa5   :  { %v439_v33 = vrot.slane %v433_v31, %v438_v32 }
  0xa6   :  { %535 = vmatpush3.bf16.xpose.msra.mxu0 %v534_v16 }
  0xad   :  { %510 = vmatmul.mubr.f32.vlgmr.msra.gmra.mrb[0].mxu0 %v342_v36 }
 0x180   :  { %v409_v34 = vpop.f32.mrb[0].mxu0 }
 0x181   :  { %v441_v37 = vadd.f32 %v439_v33, %v409_v34  ;;  %v511_v38 = vpop.f32.mrb[1].mxu0 }
 0x183   :  { %442 = vst [vmem:[#allocation11] sm:$0xff] %v441_v37 }
 0x184   :  { %713 = shalt.err (!%p710_p8)
}
 0x185   :  { %s714_s4 = scalar_lea.hbm %s1007_s7, 128 }
 0x186   :  { %p715_p9 = scmp.ne.s32.totalorder %s1007_s7, %s714_s4  ;;  %p718_p10 = scmp.lt.u32.totalorder %s714_s4, %s1007_s7 }
 0x188   :  { %p720_p11 = pnand %p718_p10, %p715_p9 }
 0x18a   :  { %723 = shalt.err (!%p720_p11)
}
 0x18b   :  { %452 = dma.vmem_to_hbm [thread:$0]  %s450_s29, 128, %s1007_s7, [#allocation5]  }
 0x18c   :  { %730 = dma.done.wait [#allocation5], 128  }
 0x18d   :  { %731 = vsyncadd [#allocation5], 4294967168 }
 0x18e   :  { %456 = vsyncpa [#allocation4], 1 }
 0x18f   :  { %457 = vsyncpa [#allocation7], 1 }
 0x190   :  { %458 = vsyncpa [#allocation10], 1 }
 0x191   :  { %459 = vsyncpa [#allocation5], 1 }

</bundles_post_ra>
